<compile_context>
chip_gen: v7x
topology: tpu7x:2x2x1
jax: 0.10.0
libtpu: 0.0.40
codegen_flags: <defaults>
</compile_context>

<pallas_src>
import jax
import jax.numpy as jnp
from jax.experimental import pallas as pl
from jax.experimental.pallas import tpu as pltpu


def _round_up(x, m):
    return ((x + m - 1) // m) * m


def _masked_onehot_gather(idx, row_base, table):
    """Row-gather of `table` via a masked one-hot contraction on the MXU.

    idx:   (TB, 1) int32; -1 marks masked / padded tokens (-> zero row).
    table: (TV, D) float32 tile whose first row has global index `row_base`.

    The one-hot operand only holds 0/1 so it is exact in bf16; only the table
    needs exact treatment, done as a 3-term bf16 split (hi+mid+lo reconstructs
    f32 exactly) => 3 MXU passes instead of the ~6 of precision=HIGHEST.
    """
    tv = table.shape[0]
    local = idx - row_base                                             # (TB, 1)
    # Loop-invariant iota; cheap VPU work that overlaps the MXU passes.
    cols = jax.lax.broadcasted_iota(jnp.int32, (idx.shape[0], tv), 1)  # (TB, TV)
    oh = jnp.where(cols == local, 1.0, 0.0).astype(jnp.bfloat16)       # (TB, TV)

    t_hi = table.astype(jnp.bfloat16)
    r1 = table - t_hi.astype(jnp.float32)
    t_mid = r1.astype(jnp.bfloat16)
    t_lo = (r1 - t_mid.astype(jnp.float32)).astype(jnp.bfloat16)

    acc = jnp.dot(oh, t_hi, preferred_element_type=jnp.float32)
    acc = acc + jnp.dot(oh, t_mid, preferred_element_type=jnp.float32)
    acc = acc + jnp.dot(oh, t_lo, preferred_element_type=jnp.float32)
    return acc


def _gather_resident_kernel(idx_ref, table_ref, o_ref):
    # Whole table resident in VMEM (constant index_map -> fetched once);
    # single vocab step -> direct store, no output read-modify-write.
    o_ref[...] = _masked_onehot_gather(idx_ref[...], 0, table_ref[...])


def _gather_tiled_kernel(idx_ref, table_ref, o_ref):
    # Vocab axis is the innermost "arbitrary" reduction; output block resident.
    v = pl.program_id(1)

    @pl.when(v == 0)
    def _():
        o_ref[...] = jnp.zeros_like(o_ref)

    tv = table_ref.shape[0]
    o_ref[...] += _masked_onehot_gather(idx_ref[...], v * tv, table_ref[...])


def shared_embedding_encoder(nodes, nodes_mask, table, *,
                             token_block=512, vocab_block=2048,
                             max_resident_table_bytes=8 * 1024 * 1024,
                             vmem_budget_bytes=40 * 1024 * 1024):
    """nodes: (B, N) int, nodes_mask: (B, N) bool, table: (V, D) float32.

    Returns (dense_embeddings (B, N, D) f32, nodes_mask).  Rows where the mask
    is False are exactly zero (torch.zeros + masked-scatter semantics).
    Out-of-range indices (>= V or < 0) produce all-zero rows (documented
    contract; PyTorch would raise instead).
    """
    B, N = nodes.shape
    V, D = table.shape
    T = B * N

    tbl = table if table.dtype == jnp.float32 else table.astype(jnp.float32)

    tb = min(token_block, _round_up(T, 8))
    resident = V * D * 4 <= max_resident_table_bytes
    tv = V if resident else min(vocab_block, _round_up(V, 8))

    def vmem_estimate(tb_, tv_):
        table_buf = tv_ * D * 4 * (1 if resident else 2)   # resident vs double-buffered
        out_buf = 2 * tb_ * D * 4                          # pipelined output block
        idx_buf = 2 * tb_ * 4
        temps = tb_ * tv_ * 2 + 3 * tv_ * D * 2            # bf16 one-hot + bf16 table split
        return table_buf + out_buf + idx_buf + temps

    # Conservative budget (fits v7x's 64 MiB-per-TC VMEM with headroom).
    while vmem_estimate(tb, tv) > vmem_budget_bytes and tb > 8:
        tb = max(8, (tb // 2) // 8 * 8)
    while (not resident) and vmem_estimate(tb, tv) > vmem_budget_bytes and tv > 8:
        tv = max(8, (tv // 2) // 8 * 8)

    t_pad = _round_up(T, tb)
    v_pad = V if resident else _round_up(V, tv)

    # Fold the mask into the index (-1 sentinel never matches the iota); pad
    # tokens also use the sentinel so padded rows are exactly zero.
    idx = jnp.where(nodes_mask, nodes.astype(jnp.int32), -1).reshape(T)
    if t_pad != T:
        idx = jnp.pad(idx, (0, t_pad - T), constant_values=-1)
    idx = idx.reshape(t_pad, 1)
    if v_pad != V:                      # only in the tiled path, and only if needed
        tbl = jnp.pad(tbl, ((0, v_pad - V), (0, 0)))

    compiler_params = pltpu.CompilerParams(
        dimension_semantics=("parallel",) if resident else ("parallel", "arbitrary"),
        vmem_limit_bytes=int(vmem_budget_bytes))

    if resident:
        grid = (t_pad // tb,)
        in_specs = [pl.BlockSpec((tb, 1), lambda i: (i, 0)),
                    pl.BlockSpec((V, D), lambda i: (0, 0))]     # fetched once, resident
        out_specs = pl.BlockSpec((tb, D), lambda i: (i, 0))
        kernel = _gather_resident_kernel
    else:
        grid = (t_pad // tb, v_pad // tv)
        in_specs = [pl.BlockSpec((tb, 1), lambda i, v: (i, 0)),
                    pl.BlockSpec((tv, D), lambda i, v: (v, 0))]
        out_specs = pl.BlockSpec((tb, D), lambda i, v: (i, 0))
        kernel = _gather_tiled_kernel

    dense = pl.pallas_call(
        kernel,
        out_shape=jax.ShapeDtypeStruct((t_pad, D), jnp.float32),
        grid_spec=pltpu.PrefetchScalarGridSpec(
            num_scalar_prefetch=0,
            grid=grid,
            in_specs=in_specs,
            out_specs=out_specs),
        compiler_params=compiler_params,
    )(idx, tbl)

    if t_pad != T:
        dense = dense[:T]
    dense = dense.reshape(B, N, D)
    return dense, nodes_mask


def reference_shared_embedding_encoder(nodes, nodes_mask, table):
    emb = jnp.take(table, nodes.reshape(-1), axis=0).reshape(
        nodes.shape + (table.shape[1],))
    return jnp.where(nodes_mask[..., None], emb, 0.0)


if __name__ == "__main__":
    key = jax.random.PRNGKey(0)
    B, N = 4, 16            # batch, nodes per example
    V, D = 256, 128         # shared-storage rows, embedding_dim
    k_nodes, k_mask, k_emb = jax.random.split(key, 3)

    nodes = jax.random.randint(k_nodes, (B, N), 0, V, dtype=jnp.int32)
    nodes_mask = jax.random.bernoulli(k_mask, 0.7, (B, N))
    # Shared embedding storage weight (trunc-normal-ish init, std=0.02).
    table = (jax.random.truncated_normal(k_emb, -2.0, 2.0, (V, D), dtype=jnp.float32)
             * 0.02)

    ref = reference_shared_embedding_encoder(nodes, nodes_mask, table)

    # 1) Default / production path: table fully VMEM-resident, single vocab step.
    dense, out_mask = shared_embedding_encoder(nodes, nodes_mask, table)
    dense = jax.block_until_ready(dense)
    assert dense.shape == (B, N, D)
    assert out_mask.shape == (B, N)
    assert jnp.allclose(dense, ref, atol=1e-6, rtol=1e-6), "resident path mismatch"
    assert bool(jnp.all(jnp.where(out_mask[..., None], True, dense == 0.0)))

    # 2) Force the vocab-tiled accumulation path (exercised at toy size).
    dense2, _ = shared_embedding_encoder(nodes, nodes_mask, table,
                                         token_block=32, vocab_block=64,
                                         max_resident_table_bytes=0)
    dense2 = jax.block_until_ready(dense2)
    assert jnp.allclose(dense2, ref, atol=1e-6, rtol=1e-6), "tiled path mismatch"
    assert bool(jnp.all(jnp.where(out_mask[..., None], True, dense2 == 0.0)))

    print("KERNEL_OK")
</pallas_src>

<mosaic_0001>
module attributes {stable_mosaic.version = 11 : i64} {
  func.func @_gather_resident_kernel(%arg0: i32, %arg1: memref<64x1xi32, #tpu.memory_space<vmem>>, %arg2: memref<256x128xf32, #tpu.memory_space<vmem>>, %arg3: memref<64x128xf32, #tpu.memory_space<vmem>>) attributes {dimension_semantics = [#tpu.dimension_semantics<parallel>], iteration_bounds = array<i64: 1>, scalar_prefetch = 0 : i64, scratch_operands = 0 : i64, tpu.core_type = #tpu.core_type<tc>, window_params = [{transform_indices = @transform_0, window_bounds = array<i64: 64, 1>}, {pipeline_mode = #tpu.pipeline_mode<synchronous>, transform_indices = @transform_1, window_bounds = array<i64: 256, 128>}, {transform_indices = @transform_2, window_bounds = array<i64: 64, 128>}]} {
    %c0 = arith.constant 0 : index
    %c0_0 = arith.constant 0 : index
    %0 = vector.load %arg1[%c0, %c0_0] : memref<64x1xi32, #tpu.memory_space<vmem>>, vector<64x1xi32>
    %c0_1 = arith.constant 0 : index
    %c0_2 = arith.constant 0 : index
    %1 = vector.load %arg2[%c0_1, %c0_2] : memref<256x128xf32, #tpu.memory_space<vmem>>, vector<256x128xf32>
    %c0_i32 = arith.constant 0 : i32
    %2 = vector.broadcast %c0_i32 : i32 to vector<64x1xi32>
    %3 = arith.subi %0, %2 : vector<64x1xi32>
    %4 = tpu.iota {dimensions = array<i32: 1>} : vector<64x256xi32>
    %5 = vector.broadcast %3 : vector<64x1xi32> to vector<64x256xi32>
    %6 = arith.cmpi eq, %4, %5 : vector<64x256xi32>
    %cst = arith.constant 1.000000e+00 : f32
    %cst_3 = arith.constant 0.000000e+00 : f32
    %7 = vector.broadcast %cst : f32 to vector<64x256xf32>
    %8 = vector.broadcast %cst_3 : f32 to vector<64x256xf32>
    %9 = arith.select %6, %7, %8 : vector<64x256xi1>, vector<64x256xf32>
    %10 = arith.truncf %9 : vector<64x256xf32> to vector<64x256xbf16>
    %11 = arith.truncf %1 : vector<256x128xf32> to vector<256x128xbf16>
    %12 = arith.extf %11 : vector<256x128xbf16> to vector<256x128xf32>
    %13 = arith.subf %1, %12 : vector<256x128xf32>
    %14 = arith.truncf %13 : vector<256x128xf32> to vector<256x128xbf16>
    %15 = arith.extf %14 : vector<256x128xbf16> to vector<256x128xf32>
    %16 = arith.subf %13, %15 : vector<256x128xf32>
    %17 = arith.truncf %16 : vector<256x128xf32> to vector<256x128xbf16>
    %cst_4 = arith.constant dense<0.000000e+00> : vector<64x128xf32>
    %18 = tpu.matmul %10, %11, %cst_4 {dimension_numbers = #tpu.dot_dimension_numbers<[1], [0], [0], [1], [0, 0, 1, 1], [], []>} : vector<64x256xbf16>, vector<256x128xbf16>, vector<64x128xf32> -> vector<64x128xf32>
    %cst_5 = arith.constant dense<0.000000e+00> : vector<64x128xf32>
    %19 = tpu.matmul %10, %14, %cst_5 {dimension_numbers = #tpu.dot_dimension_numbers<[1], [0], [0], [1], [0, 0, 1, 1], [], []>} : vector<64x256xbf16>, vector<256x128xbf16>, vector<64x128xf32> -> vector<64x128xf32>
    %20 = arith.addf %18, %19 : vector<64x128xf32>
    %cst_6 = arith.constant dense<0.000000e+00> : vector<64x128xf32>
    %21 = tpu.matmul %10, %17, %cst_6 {dimension_numbers = #tpu.dot_dimension_numbers<[1], [0], [0], [1], [0, 0, 1, 1], [], []>} : vector<64x256xbf16>, vector<256x128xbf16>, vector<64x128xf32> -> vector<64x128xf32>
    %22 = arith.addf %20, %21 : vector<64x128xf32>
    %c0_7 = arith.constant 0 : index
    %c0_8 = arith.constant 0 : index
    %23 = vector.load %arg3[%c0_7, %c0_8] : memref<64x128xf32, #tpu.memory_space<vmem>>, vector<64x128xf32>
    tpu.vector_store %arg3[%c0_7, %c0_8], %22 {strides = array<i32>} : memref<64x128xf32, #tpu.memory_space<vmem>>, vector<64x128xf32>,
    return
  }
  func.func @transform_0(%arg0: i32) -> (i32, i32) {
    %c0_i32 = arith.constant 0 : i32
    %c0_i32_0 = arith.constant 0 : i32
    return %arg0, %c0_i32 : i32, i32
  }
  func.func @transform_1(%arg0: i32) -> (i32, i32) {
    %c0_i32 = arith.constant 0 : i32
    %c0_i32_0 = arith.constant 0 : i32
    %c0_i32_1 = arith.constant 0 : i32
    return %c0_i32, %c0_i32_0 : i32, i32
  }
  func.func @transform_2(%arg0: i32) -> (i32, i32) {
    %c0_i32 = arith.constant 0 : i32
    %c0_i32_0 = arith.constant 0 : i32
    return %arg0, %c0_i32 : i32, i32
  }
}

</mosaic_0001>

<bundles_post_ra>
// kernel: tpu_custom_call.1
= control target key start
LH: loop header
LB: loop body
LE: loop exit
PB: predicated region body
PF: predicated region fallthrough
CT: control target
= control target key end

     0   :  { %7 = vsyncpa [#allocation3], 0  ;;  %s1159_s0 = inlined_call_operand.vmem [shape: s32[64,1], index: 0, kind: input, shape index: {}]   ;;  %s1160_s1 = inlined_call_operand.hbm [shape: f32[256,128], index: 1, kind: input, shape index: {}]   ;;  %s1161_s2 = inlined_call_operand.hbm [shape: f32[64,128], index: 2, kind: output, shape index: {}]  }
   0x1   :  { %8 = vsyncpa [#allocation4], 0  ;;  %s778_s9 = smov [#allocation2]   ;;  %s730_s13 = scalar_lea.hbm %s1160_s1, 4096 }
   0x2   :  { %s16_s10 = sshll.u32 %s778_s9, 4  ;;  %p731_p0 = scmp.ne.s32.totalorder %s1160_s1, %s730_s13  ;;  %s17_s10 = int_to_ptr.vmem [resolvable:$true] %s16_s10 }
   0x3   :  { %p734_p1 = scmp.lt.u32.totalorder %s730_s13, %s1160_s1 }
   0x5   :  { %p736_p2 = pnand %p734_p1, %p731_p0 }
   0x7   :  { %739 = shalt.err (!%p736_p2)
}
   0x8   :  { %s740_s18 = scalar_lea.vmem %s17_s10, 4096  ;;  %p745_p4 = scmp.lt.s32.totalorder %s17_s10, %s17_s10 }
   0x9   :  { %p741_p3 = scmp.ne.s32.totalorder %s17_s10, %s740_s18  ;;  %p746_p5 = scmp.lt.s32.totalorder %s740_s18, %s740_s18 }
   0xb   :  { %p747_p6 = por %p746_p5, %p745_p4 }
   0xd   :  { %p748_p7 = pnand %p747_p6, %p741_p3 }
   0xf   :  { %751 = shalt.err (!%p748_p7)
}
  0x10   :  { %s779_s19 = smov 128   ;;  %s780_s20 = smov 8  }
  0x11   :  { %22 = dma.hbm_to_vmem [thread:$0]  %s1160_s1, 4096, %s17_s10, [#allocation3], %s779_s19, %s779_s19, %s780_s20  }
  0x12   :  { %774 = dma.done.wait [#allocation3], 4096  }
  0x13   :  { %775 = vsyncadd [#allocation3], 4294963200  ;;  %v781_v0 = vmov 0   ;;  %v29_v1 = vld [vmem:[%s1159_s0 + $0x10] sm:$0xff]  ;;  %v27_v2 = vld [vmem:[%s1159_s0] sm:$0xff] }
  0x14   :  { %729 = vset.pattern.permute.xlu1 %v781_v0  ;;  %728 = vset.pattern.permute.xlu0 %v781_v0  ;;  %v30_v3 = vld [vmem:[%s1159_s0 + $0x18] sm:$0xff]  ;;  %v28_v4 = vld [vmem:[%s1159_s0 + $0x8] sm:$0xff]  ;;  %v51_v5 = vld [vmem:[#allocation2 + $0x80] sm:$0xff] }
  0x15   :  { %77 = vperm.xlu1 %729, %v29_v1   ;;  %71 = vperm.xlu0 %728, %v27_v2   ;;  %v52_v6 = vld [vmem:[#allocation2 + $0x88] sm:$0xff]  ;;  %v35_v7 = vld [vmem:[#allocation2] sm:$0xff]  ;;  %v53_v11 = vld [vmem:[#allocation2 + $0x90] sm:$0xff] }
  0x16   :  { %v36_v8 = vld [vmem:[#allocation2 + $0x8] sm:$0xff]  ;;  %v142_v9 = vpack.c.bf16 %v52_v6, %v51_v5  ;;  %v54_v12 = vld [vmem:[#allocation2 + $0x98] sm:$0xff]  ;;  %v37_v13 = vld [vmem:[#allocation2 + $0x10] sm:$0xff] }
  0x17   :  { %v134_v10 = vpack.c.bf16 %v36_v8, %v35_v7  ;;  %v143_v14 = vpack.c.bf16 %v54_v12, %v53_v11  ;;  %v38_v15 = vld [vmem:[#allocation2 + $0x18] sm:$0xff]  ;;  %v55_v16 = vld [vmem:[#allocation2 + $0xa0] sm:$0xff]  ;;  %v56_v17 = vld [vmem:[#allocation2 + $0xa8] sm:$0xff] }
  0x18   :  { %v32_v18 = vld [vmem:[%s1159_s0 + $0x28] sm:$0xff]  ;;  %v31_v19 = vld [vmem:[%s1159_s0 + $0x20] sm:$0xff]  ;;  %v166_v20 = vunpack.c.l.bf16 %v142_v9  ;;  %v167_v21 = vunpack.c.h.bf16 %v142_v9  ;;  %626 = vmatprep.subr.bf16.mxu1 %v142_v9  ;;  %v135_v26 = vpack.c.bf16 %v38_v15, %v37_v13  ;;  %v144_v27 = vpack.c.bf16 %v56_v17, %v55_v16  ;;  %v34_v34 = vld [vmem:[%s1159_s0 + $0x38] sm:$0xff] }
  0x19   :  { %80 = vperm.xlu1 %729, %v30_v3   ;;  %74 = vperm.xlu0 %728, %v28_v4   ;;  %v150_v22 = vunpack.c.l.bf16 %v134_v10  ;;  %v151_v23 = vunpack.c.h.bf16 %v134_v10  ;;  %v168_v24 = vunpack.c.l.bf16 %v143_v14  ;;  %v169_v25 = vunpack.c.h.bf16 %v143_v14  ;;  %v39_v32 = vld [vmem:[#allocation2 + $0x20] sm:$0xff]  ;;  %v40_v33 = vld [vmem:[#allocation2 + $0x28] sm:$0xff]  ;;  %v33_v39 = vld [vmem:[%s1159_s0 + $0x30] sm:$0xff]  ;;  %s783_s0 = smov [#allocation5]  }
  0x1a   :  { %627 = vmatpush3.bf16.msra.mxu1 %v134_v10  ;;  %v832_v28 = vsub.f32 %v51_v5, %v166_v20  ;;  %v834_v29 = vsub.f32 %v52_v6, %v167_v21  ;;  %v152_v37 = vunpack.c.l.bf16 %v135_v26  ;;  %v153_v38 = vunpack.c.h.bf16 %v135_v26  ;;  %v57_v44 = vld [vmem:[#allocation2 + $0xb0] sm:$0xff]  ;;  %v58_v45 = vld [vmem:[#allocation2 + $0xb8] sm:$0xff]  ;;  %v59_v0 = vld [vmem:[#allocation2 + $0xc0] sm:$0xff]  ;;  %s526_s10 = sshll.u32 %s783_s0, 4  ;;  %s527_s10 = int_to_ptr.vmem [resolvable:$true] %s526_s10 }
  0x1b   :  { %v182_v30 = vsub.f32 %v35_v7, %v150_v22  ;;  %v183_v31 = vsub.f32 %v36_v8, %v151_v23  ;;  %628 = vmatprep.subr.bf16.mxu1 %v143_v14  ;;  %v839_v35 = vsub.f32 %v53_v11, %v168_v24  ;;  %v841_v36 = vsub.f32 %v54_v12, %v169_v25  ;;  %v41_v50 = vld [vmem:[#allocation2 + $0x30] sm:$0xff]  ;;  %v42_v51 = vld [vmem:[#allocation2 + $0x38] sm:$0xff]  ;;  %v60_v1 = vld [vmem:[#allocation2 + $0xc8] sm:$0xff]  ;;  %s752_s11 = scalar_lea.vmem %s527_s10, 1024  ;;  %p757_p9 = scmp.lt.s32.totalorder %s527_s10, %s527_s10 }
  0x1c   :  { %v848_v40 = vpack.c.bf16 %v834_v29, %v832_v28  ;;  %v170_v42 = vunpack.c.l.bf16 %v144_v27  ;;  %v171_v43 = vunpack.c.h.bf16 %v144_v27  ;;  %v184_v47 = vsub.f32 %v37_v13, %v152_v37  ;;  %v43_v10 = vld [vmem:[#allocation2 + $0x40] sm:$0xff]  ;;  %p753_p8 = scmp.ne.s32.totalorder %s527_s10, %s752_s11  ;;  %p758_p10 = scmp.lt.s32.totalorder %s752_s11, %s752_s11 }
  0x1d   :  { %86 = vperm.xlu1 %729, %v32_v18   ;;  %83 = vperm.xlu0 %728, %v31_v19   ;;  %v214_v41 = vpack.c.bf16 %v183_v31, %v182_v30  ;;  %v852_v46 = vpack.c.bf16 %v841_v36, %v839_v35  ;;  %v185_v48 = vsub.f32 %v38_v15, %v153_v38  ;;  %v44_v15 = vld [vmem:[#allocation2 + $0x48] sm:$0xff] }
  0x1e   :  { %629 = vmatpush3.bf16.msra.mxu1 %v135_v26  ;;  %v136_v49 = vpack.c.bf16 %v40_v33, %v39_v32  ;;  %586 = vmatprep.subr.bf16.mxu0 %v848_v40  ;;  %v855_v54 = vsub.f32 %v55_v16, %v170_v42  ;;  %v857_v55 = vsub.f32 %v56_v17, %v171_v43  ;;  %v61_v16 = vld [vmem:[#allocation2 + $0xd0] sm:$0xff]  ;;  %v62_v17 = vld [vmem:[#allocation2 + $0xd8] sm:$0xff]  ;;  %p759_p11 = por %p758_p10, %p757_p9 }
  0x1f   :  { %v230_v52 = vunpack.c.l.bf16 %v214_v41  ;;  %v231_v53 = vunpack.c.h.bf16 %v214_v41  ;;  %630 = vmatprep.subr.bf16.mxu1 %v144_v27  ;;  %v215_v56 = vpack.c.bf16 %v185_v48, %v184_v47  ;;  %v145_v59 = vpack.c.bf16 %v58_v45, %v57_v44  ;;  %587 = vmatpush3.bf16.msra.mxu0 %v214_v41 }
  0x20   :  { %v154_v57 = vunpack.c.l.bf16 %v136_v49  ;;  %v155_v58 = vunpack.c.h.bf16 %v136_v49  ;;  %v865_v62 = vpack.c.bf16 %v857_v55, %v855_v54  ;;  %v137_v63 = vpack.c.bf16 %v42_v51, %v41_v50  ;;  %588 = vmatprep.subr.bf16.mxu0 %v852_v46  ;;  %p760_p12 = pnand %p759_p11, %p753_p8 }
  0x21   :  { %92 = vperm.xlu1 %729, %v34_v34   ;;  %89 = vperm.xlu0 %728, %v33_v39   ;;  %v859_v60 = vsub.f32 %v182_v30, %v230_v52  ;;  %v861_v61 = vsub.f32 %v183_v31, %v231_v53  ;;  %v232_v2 = vunpack.c.l.bf16 %v215_v56  ;;  %v233_v3 = vunpack.c.h.bf16 %v215_v56  ;;  %v48_v53 = vld [vmem:[#allocation2 + $0x68] sm:$0xff] }
  0x22   :  { %v186_v4 = vsub.f32 %v39_v32, %v154_v57  ;;  %v187_v5 = vsub.f32 %v40_v33, %v155_v58  ;;  %631 = vmatpush3.bf16.msra.mxu1 %v136_v49  ;;  %v172_v6 = vunpack.c.l.bf16 %v145_v59  ;;  %v173_v7 = vunpack.c.h.bf16 %v145_v59  ;;  %v45_v32 = vld [vmem:[#allocation2 + $0x50] sm:$0xff]  ;;  %v46_v33 = vld [vmem:[#allocation2 + $0x58] sm:$0xff] }
  0x23   :  { %632 = vmatprep.subr.bf16.mxu1 %v145_v59  ;;  %v156_v8 = vunpack.c.l.bf16 %v137_v63  ;;  %v157_v9 = vunpack.c.h.bf16 %v137_v63  ;;  %v868_v11 = vsub.f32 %v184_v47, %v232_v2  ;;  %v870_v12 = vsub.f32 %v185_v48, %v233_v3  ;;  %589 = vmatpush3.bf16.msra.mxu0 %v215_v56  ;;  %v64_v47 = vld [vmem:[#allocation2 + $0xe8] sm:$0xff]  ;;  %v47_v48 = vld [vmem:[#allocation2 + $0x60] sm:$0xff]  ;;  %v65_v56 = vld [vmem:[#allocation2 + $0xf0] sm:$0xff] }
  0x24   :  { %v216_v13 = vpack.c.bf16 %v187_v5, %v186_v4  ;;  %v146_v14 = vpack.c.bf16 %v60_v1, %v59_v0  ;;  %v872_v18 = vsub.f32 %v57_v44, %v172_v6  ;;  %v874_v19 = vsub.f32 %v58_v45, %v173_v7  ;;  %590 = vmatprep.subr.bf16.mxu0 %v865_v62  ;;  %v63_v45 = vld [vmem:[#allocation2 + $0xe0] sm:$0xff]  ;;  %v66_v57 = vld [vmem:[#allocation2 + $0xf8] sm:$0xff] }
  0x25   :  { %v188_v20 = vsub.f32 %v41_v50, %v156_v8  ;;  %v189_v21 = vsub.f32 %v42_v51, %v157_v9  ;;  %v138_v30 = vpack.c.bf16 %v44_v15, %v43_v10  ;;  %v147_v31 = vpack.c.bf16 %v62_v17, %v61_v16 }
  0x26   :  { %v234_v22 = vunpack.c.l.bf16 %v216_v13  ;;  %v235_v23 = vunpack.c.h.bf16 %v216_v13  ;;  %633 = vmatpush3.bf16.msra.mxu1 %v137_v63  ;;  %v174_v24 = vunpack.c.l.bf16 %v146_v14  ;;  %v175_v25 = vunpack.c.h.bf16 %v146_v14 }
  0x27   :  { %v879_v26 = vpack.c.bf16 %v874_v19, %v872_v18  ;;  %v217_v27 = vpack.c.bf16 %v189_v21, %v188_v20  ;;  %634 = vmatprep.subr.bf16.mxu1 %v146_v14  ;;  %591 = vmatpush3.bf16.msra.mxu0 %v216_v13  ;;  %v158_v43 = vunpack.c.l.bf16 %v138_v30  ;;  %v159_v44 = vunpack.c.h.bf16 %v138_v30 }
  0x28   :  { %v881_v34 = vsub.f32 %v186_v4, %v234_v22  ;;  %v883_v37 = vsub.f32 %v187_v5, %v235_v23  ;;  %v885_v38 = vsub.f32 %v59_v0, %v174_v24  ;;  %v887_v39 = vsub.f32 %v60_v1, %v175_v25  ;;  %v49_v24 = vld [vmem:[#allocation2 + $0x70] sm:$0xff]  ;;  %v50_v25 = vld [vmem:[#allocation2 + $0x78] sm:$0xff] }
  0x29   :  { %v236_v41 = vunpack.c.l.bf16 %v217_v27  ;;  %v237_v42 = vunpack.c.h.bf16 %v217_v27  ;;  %592 = vmatprep.subr.bf16.mxu0 %v879_v26  ;;  %v176_v50 = vunpack.c.l.bf16 %v147_v31  ;;  %v177_v51 = vunpack.c.h.bf16 %v147_v31 }
  0x2a   :  { %v892_v49 = vpack.c.bf16 %v887_v39, %v885_v38  ;;  %635 = vmatpush3.bf16.msra.mxu1 %v138_v30  ;;  %v139_v52 = vpack.c.bf16 %v46_v33, %v45_v32  ;;  %v190_v63 = vsub.f32 %v43_v10, %v158_v43  ;;  %v191_v0 = vsub.f32 %v44_v15, %v159_v44 }
  0x2b   :  { %v894_v58 = vsub.f32 %v188_v20, %v236_v41  ;;  %v896_v59 = vsub.f32 %v189_v21, %v237_v42  ;;  %636 = vmatprep.subr.bf16.mxu1 %v147_v31  ;;  %v898_v1 = vsub.f32 %v61_v16, %v176_v50  ;;  %v900_v2 = vsub.f32 %v62_v17, %v177_v51 }
  0x2c   :  { %v160_v3 = vunpack.c.l.bf16 %v139_v52  ;;  %v161_v4 = vunpack.c.h.bf16 %v139_v52  ;;  %593 = vmatpush3.bf16.msra.mxu0 %v217_v27  ;;  %v218_v5 = vpack.c.bf16 %v191_v0, %v190_v63  ;;  %v148_v6 = vpack.c.bf16 %v64_v47, %v63_v45 }
  0x2d   :  { %v140_v7 = vpack.c.bf16 %v48_v53, %v47_v48  ;;  %v149_v8 = vpack.c.bf16 %v66_v57, %v65_v56  ;;  %594 = vmatprep.subr.bf16.mxu0 %v892_v49  ;;  %v905_v9 = vpack.c.bf16 %v900_v2, %v898_v1 }
  0x2e   :  { %v192_v10 = vsub.f32 %v45_v32, %v160_v3  ;;  %v193_v13 = vsub.f32 %v46_v33, %v161_v4  ;;  %637 = vmatpush3.bf16.msra.mxu1 %v139_v52  ;;  %v238_v14 = vunpack.c.l.bf16 %v218_v5  ;;  %v239_v15 = vunpack.c.h.bf16 %v218_v5 }
  0x2f   :  { %v178_v16 = vunpack.c.l.bf16 %v148_v6  ;;  %v179_v17 = vunpack.c.h.bf16 %v148_v6  ;;  %638 = vmatprep.subr.bf16.mxu1 %v148_v6  ;;  %v162_v21 = vunpack.c.l.bf16 %v140_v7  ;;  %v163_v22 = vunpack.c.h.bf16 %v140_v7 }
  0x30   :  { %v219_v20 = vpack.c.bf16 %v193_v13, %v192_v10  ;;  %v180_v23 = vunpack.c.l.bf16 %v149_v8  ;;  %v907_v27 = vsub.f32 %v190_v63, %v238_v14  ;;  %v909_v30 = vsub.f32 %v191_v0, %v239_v15  ;;  %595 = vmatpush3.bf16.msra.mxu0 %v218_v5 }
  0x31   :  { %v911_v31 = vsub.f32 %v63_v45, %v178_v16  ;;  %v913_v32 = vsub.f32 %v64_v47, %v179_v17  ;;  %596 = vmatprep.subr.bf16.mxu0 %v905_v9  ;;  %v194_v42 = vsub.f32 %v47_v48, %v162_v21  ;;  %v195_v43 = vsub.f32 %v48_v53, %v163_v22 }
  0x32   :  { %v240_v33 = vunpack.c.l.bf16 %v219_v20  ;;  %v241_v41 = vunpack.c.h.bf16 %v219_v20  ;;  %639 = vmatpush3.bf16.msra.mxu1 %v140_v7  ;;  %v181_v50 = vunpack.c.h.bf16 %v149_v8  ;;  %v920_v51 = vsub.f32 %v65_v56, %v180_v23 }
  0x33   :  { %v918_v44 = vpack.c.bf16 %v913_v32, %v911_v31  ;;  %640 = vmatprep.subr.bf16.mxu1 %v149_v8  ;;  %v141_v52 = vpack.c.bf16 %v50_v25, %v49_v24  ;;  %v220_v47 = vpack.c.bf16 %v195_v43, %v194_v42  ;;  %v246_v0 = vunpack.c.l.bf16 %v848_v40 }
  0x34   :  { %v272_v45 = vsub.f32 %v192_v10, %v240_v33  ;;  %v273_v63 = vsub.f32 %v193_v13, %v241_v41  ;;  %597 = vmatpush3.bf16.msra.mxu0 %v219_v20  ;;  %v923_v3 = vsub.f32 %v66_v57, %v181_v50  ;;  %v247_v4 = vunpack.c.h.bf16 %v848_v40 }
  0x35   :  { %v164_v48 = vunpack.c.l.bf16 %v141_v52  ;;  %v165_v53 = vunpack.c.h.bf16 %v141_v52  ;;  %598 = vmatprep.subr.bf16.mxu0 %v918_v44  ;;  %v242_v5 = vunpack.c.l.bf16 %v220_v47  ;;  %v243_v6 = vunpack.c.h.bf16 %v220_v47 }
  0x36   :  { %641 = vmatpush3.bf16.msra.mxu1 %v141_v52  ;;  %v278_v56 = vsub.f32 %v832_v28, %v246_v0  ;;  %v930_v7 = vpack.c.bf16 %v861_v61, %v859_v60  ;;  %v229_v8 = vpack.c.bf16 %v923_v3, %v920_v51  ;;  %v279_v13 = vsub.f32 %v834_v29, %v247_v4 }
  0x37   :  { %v196_v57 = vsub.f32 %v49_v24, %v164_v48  ;;  %v197_v10 = vsub.f32 %v50_v25, %v165_v53  ;;  %v274_v14 = vsub.f32 %v194_v42, %v242_v5  ;;  %v275_v40 = vsub.f32 %v195_v43, %v243_v6 }
  0x38   :  { %v248_v15 = vunpack.c.l.bf16 %v852_v46  ;;  %v249_v16 = vunpack.c.h.bf16 %v852_v46  ;;  %599 = vmatpush3.bf16.msra.mxu0 %v220_v47  ;;  %v302_v28 = vpack.c.bf16 %v279_v13, %v278_v56  ;;  %v939_v60 = vpack.c.bf16 %v870_v12, %v868_v11 }
  0x39   :  { %v221_v17 = vpack.c.bf16 %v197_v10, %v196_v57  ;;  %v250_v61 = vunpack.c.l.bf16 %v865_v62  ;;  %600 = vmatprep.subr.bf16.mxu0 %v229_v8  ;;  %v251_v21 = vunpack.c.h.bf16 %v865_v62  ;;  %v947_v22 = vpack.c.bf16 %v883_v37, %v881_v34 }
  0x3a   :  { %v280_v20 = vsub.f32 %v839_v35, %v248_v15  ;;  %v281_v29 = vsub.f32 %v841_v36, %v249_v16  ;;  %706 = vmatprep.subr.bf16.mxu1 %v302_v28  ;;  %v252_v11 = vunpack.c.l.bf16 %v879_v26  ;;  %v253_v35 = vunpack.c.h.bf16 %v879_v26 }
  0x3b   :  { %v244_v46 = vunpack.c.l.bf16 %v221_v17  ;;  %v245_v23 = vunpack.c.h.bf16 %v221_v17  ;;  %v282_v24 = vsub.f32 %v855_v54, %v250_v61  ;;  %v283_v25 = vsub.f32 %v857_v55, %v251_v21 }
  0x3c   :  { %v951_v12 = vpack.c.bf16 %v281_v29, %v280_v20  ;;  %v957_v36 = vpack.c.bf16 %v896_v59, %v894_v58  ;;  %601 = vmatpush3.bf16.msra.mxu0 %v221_v17  ;;  %v284_v37 = vsub.f32 %v872_v18, %v252_v11  ;;  %v254_v33 = vunpack.c.l.bf16 %v892_v49 }
  0x3d   :  { %v276_v62 = vsub.f32 %v196_v57, %v244_v46  ;;  %v277_v34 = vsub.f32 %v197_v10, %v245_v23  ;;  %666 = vmatprep.subr.bf16.mxu0 %v302_v28  ;;  %v304_v54 = vpack.c.bf16 %v283_v25, %v282_v24  ;;  %v285_v41 = vsub.f32 %v874_v19, %v253_v35 }
  0x3e   :  { %v255_v42 = vunpack.c.h.bf16 %v892_v49  ;;  %v965_v55 = vpack.c.bf16 %v909_v30, %v907_v27  ;;  %v286_v26 = vsub.f32 %v885_v38, %v254_v33  ;;  %v256_v58 = vunpack.c.l.bf16 %v905_v9 }
  0x3f   :  { %v257_v59 = vunpack.c.h.bf16 %v905_v9  ;;  %v970_v43 = vpack.c.bf16 %v273_v63, %v272_v45  ;;  %v972_v18 = vpack.c.bf16 %v285_v41, %v284_v37  ;;  %v258_v19 = vunpack.c.l.bf16 %v918_v44 }
  0x40   :  { %v287_v50 = vsub.f32 %v887_v39, %v255_v42  ;;  %v259_v49 = vunpack.c.h.bf16 %v918_v44  ;;  %v288_v52 = vsub.f32 %v898_v1, %v256_v58  ;;  %v979_v30 = vpack.c.bf16 %v275_v40, %v274_v14 }
  0x41   :  { %v289_v27 = vsub.f32 %v900_v2, %v257_v59  ;;  %v260_v38 = vunpack.c.l.bf16 %v229_v8  ;;  %v290_v9 = vsub.f32 %v911_v31, %v258_v19  ;;  %v261_v63 = vunpack.c.h.bf16 %v229_v8 }
  0x42   :  { %v981_v47 = vpack.c.bf16 %v287_v50, %v286_v26  ;;  %v291_v45 = vsub.f32 %v913_v32, %v259_v49  ;;  %v988_v48 = vpack.c.bf16 %v277_v34, %v276_v62  ;;  %v67_v53 = vlaneseq }
  0x43   :  { %v985_v0 = vpack.c.bf16 %v289_v27, %v288_v52  ;;  %v292_v39 = vsub.f32 %v920_v51, %v260_v38  ;;  %v293_v1 = vsub.f32 %v923_v3, %v261_v63  ;;  %v782_v57 = vmov 1.0|1.0  }
  0x44   :  { %v990_v44 = vpack.c.bf16 %v291_v45, %v290_v9  ;;  %v995_v4 = vand.u32 127, %v67_v53 }
  0x45   :  { %v993_v2 = vpack.c.bf16 %v293_v1, %v292_v39 }
  0x46   :  { %v69_v32 = vadd.s32 128, %v995_v4 }
  0x94   :  { %v78_v5 = vpop.permute.xlu1 %77  ;;  %v72_v31 = vpop.permute.xlu0 %71 }
  0x95   :  { %vm99_vm2 = vcmp.eq.s32.totalorder %v69_v32, %v78_v5  ;;  %vm94_vm3 = vcmp.eq.s32.totalorder %v995_v4, %v72_v31  ;;  %vm95_vm5 = vcmp.eq.s32.totalorder %v69_v32, %v72_v31  ;;  %vm98_vm9 = vcmp.eq.s32.totalorder %v995_v4, %v78_v5 }
  0x98   :  { %v75_v6 = vpop.permute.xlu0 %74  ;;  %v81_v56 = vpop.permute.xlu1 %80 }
  0x99   :  { %vm96_vm0 = vcmp.eq.s32.totalorder %v995_v4, %v75_v6  ;;  %vm97_vm1 = vcmp.eq.s32.totalorder %v69_v32, %v75_v6  ;;  %vm101_vm4 = vcmp.eq.s32.totalorder %v69_v32, %v81_v56  ;;  %vm100_vm10 = vcmp.eq.s32.totalorder %v995_v4, %v81_v56 }
  0x9a   :  { %vm1000_vm6 = vmpackc.low %vm96_vm0, %vm94_vm3 }
  0x9b   :  { %vm1004_vm7 = vmpackc.low %vm97_vm1, %vm95_vm5 }
  0x9c   :  { %vm1008_vm8 = vmpackc.low %vm101_vm4, %vm99_vm2  ;;  %539 = vmatprep.mubr.msk.bf16.mxu0 %vm1004_vm7, %v782_v57  ;;  %555 = vmatprep.mubr.msk.bf16.mxu1 %vm1004_vm7, %v782_v57  ;;  %v87_v10 = vpop.permute.xlu1 %86  ;;  %v84_v13 = vpop.permute.xlu0 %83 }
  0x9d   :  { %541 = vmatmul.mubr.msk.bf16.vlgmr.msra.gmra.mrb[0].mxu0 %vm1000_vm6, %v782_v57  ;;  %557 = vmatmul.mubr.msk.bf16.vlgmr.msra.gmra.mrb[0].mxu1 %vm1000_vm6, %v782_v57  ;;  %vm105_vm11 = vcmp.eq.s32.totalorder %v69_v32, %v87_v10  ;;  %vm103_vm12 = vcmp.eq.s32.totalorder %v69_v32, %v84_v13  ;;  %vm1038_vm13 = vmpackc.low %vm100_vm10, %vm98_vm9  ;;  %vm104_vm15 = vcmp.eq.s32.totalorder %v995_v4, %v87_v10 }
  0x9e   :  { %667 = vmatpush3.bf16.msra.mxu0 %v930_v7  ;;  %714 = vmatpush3.bf16.msra.mxu1 %v930_v7  ;;  %vm1048_vm14 = vmpackc.low %vm105_vm11, %vm103_vm12  ;;  %vm102_vm0 = vcmp.eq.s32.totalorder %v995_v4, %v84_v13 }
  0x9f   :  { %543 = vmatprep.mubr.msk.bf16.mxu0 %vm1008_vm8, %v782_v57  ;;  %559 = vmatprep.mubr.msk.bf16.mxu1 %vm1008_vm8, %v782_v57  ;;  %vm1068_vm3 = vmpackc.low %vm104_vm15, %vm102_vm0 }
  0xa0   :  { %668 = vmatprep.subr.bf16.mxu0 %v951_v12  ;;  %707 = vmatprep.subr.bf16.mxu1 %v951_v12  ;;  %v93_v40 = vpop.permute.xlu1 %92  ;;  %v90_v15 = vpop.permute.xlu0 %89 }
  0xa1   :  { %vm109_vm1 = vcmp.eq.s32.totalorder %v69_v32, %v93_v40  ;;  %vm107_vm2 = vcmp.eq.s32.totalorder %v69_v32, %v90_v15  ;;  %vm108_vm5 = vcmp.eq.s32.totalorder %v995_v4, %v93_v40  ;;  %vm106_vm9 = vcmp.eq.s32.totalorder %v995_v4, %v90_v15 }
  0xa2   :  { %669 = vmatpush3.bf16.msra.mxu0 %v939_v60  ;;  %715 = vmatpush3.bf16.msra.mxu1 %v939_v60  ;;  %vm1078_vm4 = vmpackc.low %vm109_vm1, %vm107_vm2 }
  0xa3   :  { %670 = vmatprep.subr.bf16.mxu0 %v304_v54  ;;  %708 = vmatprep.subr.bf16.mxu1 %v304_v54  ;;  %vm1098_vm10 = vmpackc.low %vm108_vm5, %vm106_vm9 }
  0xa5   :  { %545 = vmatmul.mubr.msk.bf16.gmra.mrb[4].mxu0 %vm1038_vm13, %v782_v57  ;;  %561 = vmatmul.mubr.msk.bf16.gmra.mrb[4].mxu1 %vm1038_vm13, %v782_v57 }
  0xa6   :  { %671 = vmatpush3.bf16.msra.mxu0 %v947_v22  ;;  %716 = vmatpush3.bf16.msra.mxu1 %v947_v22 }
  0xa7   :  { %547 = vmatprep.mubr.msk.bf16.mxu0 %vm1048_vm14, %v782_v57  ;;  %563 = vmatprep.mubr.msk.bf16.mxu1 %vm1048_vm14, %v782_v57 }
  0xa8   :  { %672 = vmatprep.subr.bf16.mxu0 %v972_v18  ;;  %709 = vmatprep.subr.bf16.mxu1 %v972_v18 }
  0xaa   :  { %673 = vmatpush3.bf16.msra.mxu0 %v957_v36  ;;  %717 = vmatpush3.bf16.msra.mxu1 %v957_v36 }
  0xab   :  { %674 = vmatprep.subr.bf16.mxu0 %v981_v47  ;;  %710 = vmatprep.subr.bf16.mxu1 %v981_v47 }
  0xad   :  { %549 = vmatmul.mubr.msk.bf16.gmra.mrb[8].mxu0 %vm1068_vm3, %v782_v57  ;;  %565 = vmatmul.mubr.msk.bf16.gmra.mrb[8].mxu1 %vm1068_vm3, %v782_v57 }
  0xae   :  { %675 = vmatpush3.bf16.msra.mxu0 %v965_v55  ;;  %718 = vmatpush3.bf16.msra.mxu1 %v965_v55 }
  0xaf   :  { %551 = vmatprep.mubr.msk.bf16.mxu0 %vm1078_vm4, %v782_v57  ;;  %567 = vmatprep.mubr.msk.bf16.mxu1 %vm1078_vm4, %v782_v57 }
  0xb0   :  { %676 = vmatprep.subr.bf16.mxu0 %v985_v0  ;;  %711 = vmatprep.subr.bf16.mxu1 %v985_v0 }
  0xb2   :  { %677 = vmatpush3.bf16.msra.mxu0 %v970_v43  ;;  %719 = vmatpush3.bf16.msra.mxu1 %v970_v43 }
  0xb3   :  { %678 = vmatprep.subr.bf16.mxu0 %v990_v44  ;;  %712 = vmatprep.subr.bf16.mxu1 %v990_v44 }
  0xb5   :  { %553 = vmatmul.mubr.msk.bf16.gmra.mrb[12].mxu0 %vm1098_vm10, %v782_v57  ;;  %569 = vmatmul.mubr.msk.bf16.gmra.mrb[12].mxu1 %vm1098_vm10, %v782_v57 }
  0xb6   :  { %679 = vmatpush3.bf16.msra.mxu0 %v979_v30  ;;  %720 = vmatpush3.bf16.msra.mxu1 %v979_v30 }
  0xb7   :  { %571 = vmatprep.mubr.msk.bf16.mxu0 %vm1004_vm7, %v782_v57  ;;  %579 = vmatprep.mubr.msk.bf16.mxu1 %vm1048_vm14, %v782_v57 }
  0xb8   :  { %680 = vmatprep.subr.bf16.mxu0 %v993_v2  ;;  %713 = vmatprep.subr.bf16.mxu1 %v993_v2 }
  0xba   :  { %681 = vmatpush3.bf16.msra.mxu0 %v988_v48  ;;  %721 = vmatpush3.bf16.msra.mxu1 %v988_v48 }
  0xbd   :  { %573 = vmatmul.mubr.msk.bf16.vlgmr.msra.gmra.mrb[16].mxu0 %vm1000_vm6, %v782_v57  ;;  %581 = vmatmul.mubr.msk.bf16.vlgmr.msra.gmra.mrb[16].mxu1 %vm1068_vm3, %v782_v57 }
  0xbe   :  { %575 = vmatprep.mubr.msk.bf16.mxu0 %vm1008_vm8, %v782_v57  ;;  %583 = vmatprep.mubr.msk.bf16.mxu1 %vm1078_vm4, %v782_v57 }
  0xc5   :  { %577 = vmatmul.mubr.msk.bf16.gmra.mrb[20].mxu0 %vm1038_vm13, %v782_v57  ;;  %585 = vmatmul.mubr.msk.bf16.gmra.mrb[20].mxu1 %vm1098_vm10, %v782_v57 }
 0x170   :  { %v602_v60 = vpop.f32.mrb[0].mxu0  ;;  %v642_v61 = vpop.f32.mrb[0].mxu1 }
 0x171   :  { %v603_v20 = vpop.f32.mrb[1].mxu0  ;;  %v643_v29 = vpop.f32.mrb[1].mxu1 }
 0x172   :  { %v604_v21 = vadd.f32 %v603_v20, %v602_v60  ;;  %v644_v22 = vadd.f32 %v643_v29, %v642_v61  ;;  %v605_v46 = vpop.f32.mrb[2].mxu0  ;;  %v645_v23 = vpop.f32.mrb[2].mxu1 }
 0x173   :  { %v606_v24 = vpop.f32.mrb[3].mxu0  ;;  %v646_v11 = vpop.f32.mrb[3].mxu1 }
 0x174   :  { %v410_v12 = vadd.f32 %v644_v22, %v604_v21  ;;  %v607_v25 = vadd.f32 %v606_v24, %v605_v46  ;;  %v647_v35 = vadd.f32 %v646_v11, %v645_v23 }
 0x176   :  { %v413_v36 = vadd.f32 %v647_v35, %v607_v25 }
 0x178   :  { %v608_v62 = vpop.f32.mrb[4].mxu0  ;;  %v648_v34 = vpop.f32.mrb[4].mxu1 }
 0x179   :  { %v609_v37 = vpop.f32.mrb[5].mxu0  ;;  %v649_v33 = vpop.f32.mrb[5].mxu1 }
 0x17a   :  { %v610_v54 = vadd.f32 %v609_v37, %v608_v62  ;;  %v650_v41 = vadd.f32 %v649_v33, %v648_v34  ;;  %v611_v42 = vpop.f32.mrb[6].mxu0  ;;  %v651_v55 = vpop.f32.mrb[6].mxu1 }
 0x17b   :  { %v612_v26 = vpop.f32.mrb[7].mxu0  ;;  %v652_v58 = vpop.f32.mrb[7].mxu1 }
 0x17c   :  { %v1138_v59 = vadd.f32 %v650_v41, %v610_v54  ;;  %v613_v43 = vadd.f32 %v612_v26, %v611_v42  ;;  %v653_v18 = vadd.f32 %v652_v58, %v651_v55 }
 0x17e   :  { %v1140_v50 = vadd.f32 %v653_v18, %v613_v43 }
 0x180   :  { %v614_v19 = vpop.f32.mrb[8].mxu0  ;;  %v654_v49 = vpop.f32.mrb[8].mxu1 }
 0x181   :  { %v615_v52 = vpop.f32.mrb[9].mxu0  ;;  %v655_v27 = vpop.f32.mrb[9].mxu1 }
 0x182   :  { %v616_v30 = vadd.f32 %v615_v52, %v614_v19  ;;  %v656_v38 = vadd.f32 %v655_v27, %v654_v49  ;;  %v617_v47 = vpop.f32.mrb[10].mxu0  ;;  %v657_v9 = vpop.f32.mrb[10].mxu1 }
 0x183   :  { %v618_v45 = vpop.f32.mrb[11].mxu0  ;;  %v658_v63 = vpop.f32.mrb[11].mxu1 }
 0x184   :  { %v426_v0 = vadd.f32 %v656_v38, %v616_v30  ;;  %v619_v39 = vadd.f32 %v618_v45, %v617_v47  ;;  %v659_v48 = vadd.f32 %v658_v63, %v657_v9 }
 0x186   :  { %v429_v44 = vadd.f32 %v659_v48, %v619_v39 }
 0x188   :  { %v620_v1 = vpop.f32.mrb[12].mxu0  ;;  %v660_v2 = vpop.f32.mrb[12].mxu1 }
 0x189   :  { %v621_v53 = vpop.f32.mrb[13].mxu0  ;;  %v661_v4 = vpop.f32.mrb[13].mxu1 }
 0x18a   :  { %v622_v5 = vadd.f32 %v621_v53, %v620_v1  ;;  %v662_v31 = vadd.f32 %v661_v4, %v660_v2  ;;  %v623_v32 = vpop.f32.mrb[14].mxu0  ;;  %v663_v6 = vpop.f32.mrb[14].mxu1 }
 0x18b   :  { %v624_v56 = vpop.f32.mrb[15].mxu0  ;;  %v664_v51 = vpop.f32.mrb[15].mxu1 }
 0x18c   :  { %v434_v3 = vadd.f32 %v662_v31, %v622_v5  ;;  %v625_v8 = vadd.f32 %v624_v56, %v623_v32  ;;  %v665_v57 = vadd.f32 %v664_v51, %v663_v6 }
 0x18e   :  { %v437_v10 = vadd.f32 %v665_v57, %v625_v8 }
 0x190   :  { %v682_v13 = vpop.f32.mrb[16].mxu0  ;;  %v694_v7 = vpop.f32.mrb[16].mxu1 }
 0x191   :  { %v683_v14 = vpop.f32.mrb[17].mxu0  ;;  %v695_v40 = vpop.f32.mrb[17].mxu1 }
 0x192   :  { %v684_v15 = vadd.f32 %v683_v14, %v682_v13  ;;  %v696_v16 = vadd.f32 %v695_v40, %v694_v7  ;;  %v685_v17 = vpop.f32.mrb[18].mxu0  ;;  %v697_v28 = vpop.f32.mrb[18].mxu1 }
 0x193   :  { %v686_v60 = vpop.f32.mrb[19].mxu0  ;;  %v698_v61 = vpop.f32.mrb[19].mxu1 }
 0x194   :  { %v505_v20 = vadd.f32 %v684_v15, %v410_v12  ;;  %v509_v29 = vadd.f32 %v696_v16, %v426_v0  ;;  %v687_v21 = vadd.f32 %v686_v60, %v685_v17  ;;  %v699_v22 = vadd.f32 %v698_v61, %v697_v28 }
 0x196   :  { %513 = vst [vmem:[#allocation5] sm:$0xff] %v505_v20  ;;  %517 = vst [vmem:[#allocation5 + $0x20] sm:$0xff] %v509_v29  ;;  %v506_v46 = vadd.f32 %v687_v21, %v413_v36  ;;  %v510_v23 = vadd.f32 %v699_v22, %v429_v44 }
 0x198   :  { %514 = vst [vmem:[#allocation5 + $0x8] sm:$0xff] %v506_v46  ;;  %518 = vst [vmem:[#allocation5 + $0x28] sm:$0xff] %v510_v23  ;;  %v688_v24 = vpop.f32.mrb[20].mxu0  ;;  %v700_v11 = vpop.f32.mrb[20].mxu1 }
 0x199   :  { %v689_v25 = vpop.f32.mrb[21].mxu0  ;;  %v701_v35 = vpop.f32.mrb[21].mxu1 }
 0x19a   :  { %v690_v62 = vadd.f32 %v689_v25, %v688_v24  ;;  %v702_v34 = vadd.f32 %v701_v35, %v700_v11  ;;  %v691_v37 = vpop.f32.mrb[22].mxu0  ;;  %v703_v33 = vpop.f32.mrb[22].mxu1 }
 0x19b   :  { %v692_v54 = vpop.f32.mrb[23].mxu0  ;;  %v704_v41 = vpop.f32.mrb[23].mxu1 }
 0x19c   :  { %v507_v12 = vadd.f32 %v690_v62, %v1138_v59  ;;  %v511_v42 = vadd.f32 %v702_v34, %v434_v3  ;;  %v693_v55 = vadd.f32 %v692_v54, %v691_v37  ;;  %v705_v36 = vadd.f32 %v704_v41, %v703_v33 }
 0x19e   :  { %515 = vst [vmem:[#allocation5 + $0x10] sm:$0xff] %v507_v12  ;;  %519 = vst [vmem:[#allocation5 + $0x30] sm:$0xff] %v511_v42  ;;  %v508_v26 = vadd.f32 %v693_v55, %v1140_v50  ;;  %v512_v58 = vadd.f32 %v705_v36, %v437_v10 }
 0x1a0   :  { %516 = vst [vmem:[#allocation5 + $0x18] sm:$0xff] %v508_v26  ;;  %520 = vst [vmem:[#allocation5 + $0x38] sm:$0xff] %v512_v58 }
 0x1a1   :  { %763 = shalt.err (!%p760_p12)
}
 0x1a2   :  { %s764_s14 = scalar_lea.hbm %s1161_s2, 1024 }
 0x1a3   :  { %p765_p13 = scmp.ne.s32.totalorder %s1161_s2, %s764_s14  ;;  %p768_p0 = scmp.lt.u32.totalorder %s764_s14, %s1161_s2 }
 0x1a5   :  { %p770_p1 = pnand %p768_p0, %p765_p13 }
 0x1a7   :  { %773 = shalt.err (!%p770_p1)
}
 0x1a8   :  { %532 = dma.vmem_to_hbm [thread:$0]  %s527_s10, 1024, %s1161_s2, [#allocation4], %s779_s19, %s779_s19, %s780_s20  }
 0x1a9   :  { %776 = dma.done.wait [#allocation4], 1024  }
 0x1aa   :  { %777 = vsyncadd [#allocation4], 4294966272 }
 0x1ab   :  { %536 = vsyncpa [#allocation3], 1 }
 0x1ac   :  { %537 = vsyncpa [#allocation4], 1 }

</bundles_post_ra>
